<compile_context>
chip_gen: v6e
topology: v6e:2x2x1
jax: 0.10.0
libtpu: 0.0.40
codegen_flags: <defaults>
</compile_context>

<pallas_src>
import functools

import jax
import jax.numpy as jnp
from jax.experimental import pallas as pl
from jax.experimental.pallas import tpu as pltpu


def _round_up(n: int, m: int) -> int:
    return ((n + m - 1) // m) * m


def _choose_tiling(batch: int, max_tile: int = 512):
    """Pick (batch_tile, padded_batch, grid_len).

    grid = cdiv(B, max_tile) first, then tile = round_up(cdiv(B, grid), 8):
    padding is at most 8*grid - 1 rows (instead of up to ~tile rows), and we
    never force a second grid step just for "parallelism" -- v5e/v6e are single
    TensorCore and the extra step is pure per-step overhead.
    """
    b8 = _round_up(max(int(batch), 1), 8)
    grid = -(-b8 // max_tile)                 # cdiv
    tile = _round_up(-(-b8 // grid), 8)       # cdiv, rounded to sublane multiple
    b_pad = grid * tile
    return tile, b_pad, grid


def prepare_actor_params(weights, biases, *, use_bf16: bool = False):
    """One-time parameter prep (hoisted out of the per-call forward).

    - Pads every layer's out-features (and therefore the next layer's
      in-features) to a multiple of 128 so all inter-layer activations and the
      final output are lane-dense.
    - Optionally casts weights to bfloat16 (MXU-native); biases stay float32.

    Returns (padded_weights, padded_biases, out_dim) where out_dim is the
    original (unpadded) action dimension -- the forward slices back to it.
    """
    assert len(weights) == len(biases)
    out_dim = int(weights[-1].shape[1])
    pw, pb = [], []
    prev_out_pad = None
    for w, b in zip(weights, biases):
        w = jnp.asarray(w, jnp.float32)
        b = jnp.asarray(b, jnp.float32).reshape(1, -1)
        in_i, out_i = int(w.shape[0]), int(w.shape[1])
        in_pad = in_i if prev_out_pad is None else prev_out_pad
        out_pad_i = _round_up(out_i, 128)
        w = jnp.pad(w, ((0, in_pad - in_i), (0, out_pad_i - out_i)))
        b = jnp.pad(b, ((0, 0), (0, out_pad_i - out_i)))
        if use_bf16:
            w = w.astype(jnp.bfloat16)
        pw.append(w)
        pb.append(b)
        prev_out_pad = out_pad_i
    return pw, pb, out_dim


def _make_actor_kernel(num_layers: int, max_action: float):
    """Builds a kernel for an MLP with `num_layers` Linear layers."""

    def kernel(*refs):
        # refs = (x_ref, w0, b0, w1, b1, ..., w_{L-1}, b_{L-1}, out_ref)
        x_ref = refs[0]
        out_ref = refs[-1]
        param_refs = refs[1:-1]

        h = x_ref[...].astype(jnp.float32)
        for i in range(num_layers):
            w = param_refs[2 * i][...]
            b = param_refs[2 * i + 1][...]
            # Cast LHS to the weight dtype (f32 or bf16); accumulate in f32.
            h = jnp.dot(h.astype(w.dtype), w,
                        preferred_element_type=jnp.float32) + b
            if i < num_layers - 1:
                h = jnp.maximum(h, 0.0)            # F.relu
            else:
                h = jnp.tanh(h) * max_action       # torch.tanh(...) * max_action
        out_ref[...] = h.astype(out_ref.dtype)

    return kernel


def actor_forward(x, weights, biases, out_dim, max_action=1.0, *,
                  max_batch_tile=512, core_parallel=False):
    """Fused Actor forward.

    x:       (B, input_dim) or (input_dim,) float32
    weights: list of (in_i_padded, out_i_padded) arrays from prepare_actor_params
    biases:  list of (1, out_i_padded) float32 arrays from prepare_actor_params
    out_dim: original (unpadded) action dimension
    core_parallel: set True only on multi-TensorCore chips (v7x) to shard the
                   batch grid axis across cores via pltpu.CORE_PARALLEL.
    """
    assert len(weights) == len(biases)
    num_layers = len(weights)

    squeeze = False
    if x.ndim == 1:
        x = x[None, :]
        squeeze = True
    B, in_dim = x.shape
    assert int(weights[0].shape[0]) == in_dim, "input_dim mismatch"
    out_pad = int(weights[-1].shape[1])        # already a multiple of 128

    # ---- batch tiling: minimal padding, no forced multi-step grid.
    tile, b_pad, grid = _choose_tiling(B, max_batch_tile)
    if b_pad != B:
        x = jnp.pad(x, ((0, b_pad - B), (0, 0)))

    kernel = _make_actor_kernel(num_layers, float(max_action))

    flat_params = []
    for w, b in zip(weights, biases):
        flat_params.extend([w, b])

    # ---- VMEM budget (explicit; v7x only has 64 MiB physical VMEM).
    param_bytes = sum(int(p.size) * p.dtype.itemsize for p in flat_params)
    act_cols = max(int(w.shape[1]) for w in weights)
    needed = (param_bytes
              + 2 * tile * in_dim * 4          # (double-buffered) x blocks
              + 2 * tile * out_pad * 4         # (double-buffered) out blocks
              + 2 * tile * act_cols * 4)       # widest live f32 intermediate
    vmem_limit = int(min(max(needed * 2, 32 << 20), 64 << 20))
    # TODO(synk): fall back to K/N-tiled BlockSpec pipelining of the weights if
    # the resident-param footprint ever approaches v7x's 64 MiB physical VMEM.

    # Advisory cost estimate so XLA schedules around this latency-bound call.
    flops = 2 * b_pad * sum(int(w.shape[0]) * int(w.shape[1]) for w in weights)
    cost = pl.CostEstimate(
        flops=flops,
        transcendentals=b_pad * out_pad,
        bytes_accessed=b_pad * (in_dim + out_pad) * 4 + param_bytes,
    )

    vmem = pltpu.MemorySpace.VMEM
    param_specs = [pl.BlockSpec(memory_space=vmem) for _ in flat_params]
    out_shape = jax.ShapeDtypeStruct((b_pad, out_pad), jnp.float32)

    if grid == 1:
        # Single block: skip the BlockSpec pipeline entirely -- no grid, no
        # pipeline prologue/epilogue, no double buffers.  x and the output are
        # whole-array VMEM residents just like the params.
        y = pl.pallas_call(
            kernel,
            out_shape=out_shape,
            in_specs=[pl.BlockSpec(memory_space=vmem)] + param_specs,
            out_specs=pl.BlockSpec(memory_space=vmem),
            compiler_params=pltpu.CompilerParams(vmem_limit_bytes=vmem_limit),
            cost_estimate=cost,
        )(x, *flat_params)
    else:
        # Multi-step grid over the batch.  Only CORE_PARALLEL actually shards
        # across TensorCores (v7x); otherwise "arbitrary" (measured ~= parallel
        # on single-TC chips).
        sem = (pltpu.CORE_PARALLEL,) if core_parallel else (pltpu.ARBITRARY,)
        y = pl.pallas_call(
            kernel,
            out_shape=out_shape,
            grid=(grid,),
            in_specs=[pl.BlockSpec((tile, in_dim), lambda i: (i, 0))]
                     + param_specs,
            out_specs=pl.BlockSpec((tile, out_pad), lambda i: (i, 0)),
            compiler_params=pltpu.CompilerParams(
                dimension_semantics=sem, vmem_limit_bytes=vmem_limit),
            cost_estimate=cost,
        )(x, *flat_params)

    y = y[:B, :out_dim]
    if squeeze:
        y = y[0]
    return y


def init_actor_params(key, input_dim, hidden_dim, output_dim):
    """Deterministic synthetic parameter init matching the module's layer shapes
    (PyTorch nn.Linear default: U(-1/sqrt(fan_in), 1/sqrt(fan_in)))."""
    dims = [input_dim] + list(hidden_dim) + [output_dim]
    weights, biases = [], []
    for i in range(len(dims) - 1):
        key, kw, kb = jax.random.split(key, 3)
        bound = 1.0 / float(dims[i]) ** 0.5
        # stored as (in, out): PyTorch W.T
        w = jax.random.uniform(kw, (dims[i], dims[i + 1]), jnp.float32, -bound, bound)
        b = jax.random.uniform(kb, (1, dims[i + 1]), jnp.float32, -bound, bound)
        weights.append(w)
        biases.append(b)
    return weights, biases


def actor_reference(x, weights, biases, max_action=1.0):
    """Plain-JAX reference of the PyTorch forward, for verification."""
    h = x
    for i, (w, b) in enumerate(zip(weights, biases)):
        h = h @ w + b
        if i < len(weights) - 1:
            h = jnp.maximum(h, 0.0)
        else:
            h = jnp.tanh(h) * max_action
    return h


if __name__ == "__main__":
    # Small, module-consistent shapes:
    #   Actor(input_dim=32, hidden_dim=[64, 64], output_dim=8, max_action=2.0)
    input_dim = 32
    hidden_dim = [64, 64]
    output_dim = 8
    max_action = 2.0
    batch = 16

    key = jax.random.PRNGKey(0)
    key, kx = jax.random.split(key)
    state = jax.random.normal(kx, (batch, input_dim), dtype=jnp.float32)

    raw_w, raw_b = init_actor_params(key, input_dim, hidden_dim, output_dim)

    # ---- f32 path (default): one-time param prep, then jitted forward.
    pw, pb, out_dim = prepare_actor_params(raw_w, raw_b, use_bf16=False)
    fwd = jax.jit(functools.partial(actor_forward, out_dim=out_dim,
                                    max_action=max_action))

    action = fwd(state, pw, pb)
    jax.block_until_ready(action)
    ref = actor_reference(state, raw_w, raw_b, max_action=max_action)
    assert action.shape == (batch, output_dim)
    assert jnp.allclose(action, ref, atol=1e-5, rtol=1e-5), "mismatch vs reference"

    # Ragged batch (not a multiple of 8): wrapper pads a handful of rows only.
    state13 = jax.random.normal(jax.random.PRNGKey(1), (13, input_dim), dtype=jnp.float32)
    action13 = fwd(state13, pw, pb)
    jax.block_until_ready(action13)
    ref13 = actor_reference(state13, raw_w, raw_b, max_action=max_action)
    assert action13.shape == (13, output_dim)
    assert jnp.allclose(action13, ref13, atol=1e-5, rtol=1e-5), "ragged-batch mismatch"

    # Single-state (1-D) convenience path, as a DDPG actor is usually called.
    a1 = fwd(state[0], pw, pb)
    jax.block_until_ready(a1)
    assert a1.shape == (output_dim,)
    assert jnp.allclose(a1, ref[0], atol=1e-5, rtol=1e-5), "single-state mismatch"

    # Larger batch exercising the multi-step gridded path (grid > 1, tile ~304).
    big = jax.random.normal(jax.random.PRNGKey(2), (600, input_dim), dtype=jnp.float32)
    abig = fwd(big, pw, pb)
    jax.block_until_ready(abig)
    refbig = actor_reference(big, raw_w, raw_b, max_action=max_action)
    assert abig.shape == (600, output_dim)
    assert jnp.allclose(abig, refbig, atol=1e-5, rtol=1e-5), "big-batch mismatch"

    # bf16 MXU path (half the param bytes, MXU-native); looser tolerance.
    pw16, pb16, _ = prepare_actor_params(raw_w, raw_b, use_bf16=True)
    fwd16 = jax.jit(functools.partial(actor_forward, out_dim=out_dim,
                                      max_action=max_action))
    a16 = fwd16(state, pw16, pb16)
    jax.block_until_ready(a16)
    assert a16.shape == (batch, output_dim)
    assert jnp.allclose(a16, ref, atol=5e-2, rtol=5e-2), "bf16 mismatch"

    print("KERNEL_OK")
</pallas_src>

<mosaic_0001>
module attributes {stable_mosaic.version = 11 : i64} {
  func.func @kernel(%arg0: memref<16x32xf32, #tpu.memory_space<vmem>>, %arg1: memref<32x128xf32, #tpu.memory_space<vmem>>, %arg2: memref<1x128xf32, #tpu.memory_space<vmem>>, %arg3: memref<128x128xf32, #tpu.memory_space<vmem>>, %arg4: memref<1x128xf32, #tpu.memory_space<vmem>>, %arg5: memref<128x128xf32, #tpu.memory_space<vmem>>, %arg6: memref<1x128xf32, #tpu.memory_space<vmem>>, %arg7: memref<16x128xf32, #tpu.memory_space<vmem>>) attributes {dimension_semantics = [], scalar_prefetch = 0 : i64, scratch_operands = 0 : i64, tpu.core_type = #tpu.core_type<tc>} {
    %c0 = arith.constant 0 : index
    %c0_0 = arith.constant 0 : index
    %0 = vector.load %arg0[%c0, %c0_0] : memref<16x32xf32, #tpu.memory_space<vmem>>, vector<16x32xf32>
    %c0_1 = arith.constant 0 : index
    %c0_2 = arith.constant 0 : index
    %1 = vector.load %arg1[%c0_1, %c0_2] : memref<32x128xf32, #tpu.memory_space<vmem>>, vector<32x128xf32>
    %c0_3 = arith.constant 0 : index
    %c0_4 = arith.constant 0 : index
    %2 = vector.load %arg2[%c0_3, %c0_4] : memref<1x128xf32, #tpu.memory_space<vmem>>, vector<1x128xf32>
    %cst = arith.constant dense<0.000000e+00> : vector<16x128xf32>
    %3 = tpu.matmul %0, %1, %cst {dimension_numbers = #tpu.dot_dimension_numbers<[1], [0], [0], [1], [0, 0, 1, 1], [], []>} : vector<16x32xf32>, vector<32x128xf32>, vector<16x128xf32> -> vector<16x128xf32>
    %4 = vector.broadcast %2 : vector<1x128xf32> to vector<16x128xf32>
    %5 = arith.addf %3, %4 : vector<16x128xf32>
    %cst_5 = arith.constant 0.000000e+00 : f32
    %6 = vector.broadcast %cst_5 : f32 to vector<16x128xf32>
    %7 = arith.maximumf %5, %6 : vector<16x128xf32>
    %c0_6 = arith.constant 0 : index
    %c0_7 = arith.constant 0 : index
    %8 = vector.load %arg3[%c0_6, %c0_7] : memref<128x128xf32, #tpu.memory_space<vmem>>, vector<128x128xf32>
    %c0_8 = arith.constant 0 : index
    %c0_9 = arith.constant 0 : index
    %9 = vector.load %arg4[%c0_8, %c0_9] : memref<1x128xf32, #tpu.memory_space<vmem>>, vector<1x128xf32>
    %cst_10 = arith.constant dense<0.000000e+00> : vector<16x128xf32>
    %10 = tpu.matmul %7, %8, %cst_10 {dimension_numbers = #tpu.dot_dimension_numbers<[1], [0], [0], [1], [0, 0, 1, 1], [], []>} : vector<16x128xf32>, vector<128x128xf32>, vector<16x128xf32> -> vector<16x128xf32>
    %11 = vector.broadcast %9 : vector<1x128xf32> to vector<16x128xf32>
    %12 = arith.addf %10, %11 : vector<16x128xf32>
    %cst_11 = arith.constant 0.000000e+00 : f32
    %13 = vector.broadcast %cst_11 : f32 to vector<16x128xf32>
    %14 = arith.maximumf %12, %13 : vector<16x128xf32>
    %c0_12 = arith.constant 0 : index
    %c0_13 = arith.constant 0 : index
    %15 = vector.load %arg5[%c0_12, %c0_13] : memref<128x128xf32, #tpu.memory_space<vmem>>, vector<128x128xf32>
    %c0_14 = arith.constant 0 : index
    %c0_15 = arith.constant 0 : index
    %16 = vector.load %arg6[%c0_14, %c0_15] : memref<1x128xf32, #tpu.memory_space<vmem>>, vector<1x128xf32>
    %cst_16 = arith.constant dense<0.000000e+00> : vector<16x128xf32>
    %17 = tpu.matmul %14, %15, %cst_16 {dimension_numbers = #tpu.dot_dimension_numbers<[1], [0], [0], [1], [0, 0, 1, 1], [], []>} : vector<16x128xf32>, vector<128x128xf32>, vector<16x128xf32> -> vector<16x128xf32>
    %18 = vector.broadcast %16 : vector<1x128xf32> to vector<16x128xf32>
    %19 = arith.addf %17, %18 : vector<16x128xf32>
    %20 = math.tanh %19 : vector<16x128xf32>
    %cst_17 = arith.constant 2.000000e+00 : f32
    %21 = vector.broadcast %cst_17 : f32 to vector<16x128xf32>
    %22 = arith.mulf %20, %21 : vector<16x128xf32>
    %c0_18 = arith.constant 0 : index
    %c0_19 = arith.constant 0 : index
    %23 = vector.load %arg7[%c0_18, %c0_19] : memref<16x128xf32, #tpu.memory_space<vmem>>, vector<16x128xf32>
    tpu.vector_store %arg7[%c0_18, %c0_19], %22 {strides = array<i32>} : memref<16x128xf32, #tpu.memory_space<vmem>>, vector<16x128xf32>,
    return
  }
}

</mosaic_0001>

<bundles_post_ra>
// kernel: actor_forward.1
= control target key start
LH: loop header
LB: loop body
LE: loop exit
PB: predicated region body
PF: predicated region fallthrough
CT: control target
= control target key end

     0   :  { %12 = vsyncpa [#allocation3], 0  ;;  %s700_s0 = inlined_call_operand.hbm [shape: f32[16,32], index: 0, kind: input, shape index: {}]   ;;  %s701_s1 = inlined_call_operand.hbm [shape: f32[32,128], index: 1, kind: input, shape index: {}]   ;;  %s702_s2 = inlined_call_operand.vmem [shape: f32[1,128], index: 2, kind: input, shape index: {}]   ;;  %s703_s3 = inlined_call_operand.hbm [shape: f32[128,128], index: 3, kind: input, shape index: {}]   ;;  %s704_s4 = inlined_call_operand.vmem [shape: f32[1,128], index: 4, kind: input, shape index: {}]   ;;  %s705_s5 = inlined_call_operand.hbm [shape: f32[128,128], index: 5, kind: input, shape index: {}]   ;;  %s706_s6 = inlined_call_operand.vmem [shape: f32[1,128], index: 6, kind: input, shape index: {}]   ;;  %s707_s7 = inlined_call_operand.vmem [shape: f32[16,128], index: 7, kind: output, shape index: {}]  }
   0x1   :  { %13 = vsyncpa [#allocation5], 0 }
   0x2   :  { %14 = vsyncpa [#allocation8], 0  ;;  %s613_s24 = smov [#allocation4]   ;;  %s614_s26 = smov [#allocation2]  }
   0x3   :  { %s32_s25 = sshll.u32 %s613_s24, 4  ;;  %s20_s27 = sshll.u32 %s614_s26, 4  ;;  %s33_s25 = int_to_ptr.vmem [resolvable:$true] %s32_s25  ;;  %s21_s27 = int_to_ptr.vmem [resolvable:$true] %s20_s27 }
   0x4   :  { %s535_s28 = scalar_lea.vmem %s33_s25, 512  ;;  %p540_p1 = scmp.lt.s32.totalorder %s33_s25, %s33_s25 }
   0x5   :  { %p536_p0 = scmp.ne.s32.totalorder %s33_s25, %s535_s28  ;;  %p541_p2 = scmp.lt.s32.totalorder %s535_s28, %s535_s28 }
   0x7   :  { %p542_p3 = por %p541_p2, %p540_p1 }
   0x9   :  { %p543_p4 = pnand %p542_p3, %p536_p0 }
   0xb   :  { %546 = shalt.err (!%p543_p4)
}
   0xc   :  { %s615_s29 = smov 128   ;;  %s616_s30 = smov 8  }
   0xd   :  { %38 = dma.hbm_to_vmem [thread:$0]  %s701_s1, 512, %s33_s25, [#allocation5], %s615_s29, %s615_s29, %s616_s30  }
   0xe   :  { %s555_s10 = scalar_lea.vmem %s21_s27, 256  ;;  %p560_p6 = scmp.lt.s32.totalorder %s21_s27, %s21_s27 }
   0xf   :  { %p556_p5 = scmp.ne.s32.totalorder %s21_s27, %s555_s10  ;;  %p561_p7 = scmp.lt.s32.totalorder %s555_s10, %s555_s10 }
  0x11   :  { %p562_p8 = por %p561_p7, %p560_p6 }
  0x13   :  { %p563_p9 = pnand %p562_p8, %p556_p5 }
  0x15   :  { %566 = shalt.err (!%p563_p9)
}
  0x16   :  { %26 = dma.hbm_to_vmem [thread:$0]  %s700_s0, 256, %s21_s27, [#allocation3], %s615_s29, %s615_s29, %s616_s30  }
  0x17   :  { %s617_s13 = smov [#allocation6]   ;;  %s618_s15 = smov [#allocation7]  }
  0x18   :  { %s46_s14 = sshll.u32 %s617_s13, 4  ;;  %s60_s16 = sshll.u32 %s618_s15, 4  ;;  %s47_s14 = int_to_ptr.vmem [resolvable:$true] %s46_s14  ;;  %s61_s16 = int_to_ptr.vmem [resolvable:$true] %s60_s16 }
  0x19   :  { %s575_s1 = scalar_lea.vmem %s47_s14, 2048  ;;  %p580_p11 = scmp.lt.s32.totalorder %s47_s14, %s47_s14 }
  0x1a   :  { %p576_p10 = scmp.ne.s32.totalorder %s47_s14, %s575_s1  ;;  %p581_p12 = scmp.lt.s32.totalorder %s575_s1, %s575_s1 }
  0x1c   :  { %p582_p13 = por %p581_p12, %p580_p11 }
  0x1e   :  { %p583_p0 = pnand %p582_p13, %p576_p10 }
  0x20   :  { %586 = shalt.err (!%p583_p0)
}
  0x21   :  { %52 = dma.hbm_to_vmem [thread:$0]  %s703_s3, 2048, %s47_s14, [#allocation5], %s615_s29, %s615_s29, %s616_s30  }
  0x22   :  { %s595_s0 = scalar_lea.vmem %s61_s16, 2048  ;;  %p600_p2 = scmp.lt.s32.totalorder %s61_s16, %s61_s16 }
  0x23   :  { %p596_p1 = scmp.ne.s32.totalorder %s61_s16, %s595_s0  ;;  %p601_p3 = scmp.lt.s32.totalorder %s595_s0, %s595_s0 }
  0x25   :  { %p602_p4 = por %p601_p3, %p600_p2 }
  0x27   :  { %p603_p5 = pnand %p602_p4, %p596_p1 }
  0x29   :  { %606 = shalt.err (!%p603_p5)
}
  0x2a   :  { %66 = dma.hbm_to_vmem [thread:$0]  %s705_s5, 2048, %s61_s16, [#allocation8], %s615_s29, %s615_s29, %s616_s30  }
  0x2b   :  { %607 = dma.done.wait [#allocation3], 256  }
  0x2c   :  { %608 = vsyncadd [#allocation3], 4294967040 }
  0x2d   :  { %609 = dma.done.wait [#allocation5], 2560  }
  0x2e   :  { %610 = vsyncadd [#allocation5], 4294964736 }
  0x2f   :  { %611 = dma.done.wait [#allocation8], 2048  }
  0x30   :  { %612 = vsyncadd [#allocation8], 4294965248  ;;  %vm94_vm0 = vcmask 261120   ;;  %v86_v0 = vld [vmem:[#allocation4 + $0x18] sm:$0xff]  ;;  %v85_v1 = vld [vmem:[#allocation4 + $0x10] sm:$0xff] }
  0x31   :  { %436 = vmatprep.subr.mxu0 %v86_v0  ;;  %v81_v2 = vld [vmem:[#allocation2] sm:$0xff]  ;;  %v84_v3 = vld [vmem:[#allocation4 + $0x8] sm:$0xff]  ;;  %v193_v4 = vld [vmem:[#allocation6 + $0x78] sm:$0xff] }
  0x32   :  { %437 = vmatpush3.msra.mxu0 %v86_v0  ;;  %444 = vmatprep.mubr.msk.f32.mxu0 %vm94_vm0, %v81_v2  ;;  %v192_v5 = vld [vmem:[#allocation6 + $0x70] sm:$0xff]  ;;  %v83_v6 = vld [vmem:[#allocation4] sm:$0xff]  ;;  %v191_v7 = vld [vmem:[#allocation6 + $0x68] sm:$0xff] }
  0x33   :  { %438 = vmatprep.subr.mxu0 %v85_v1  ;;  %447 = vmatprep.subr.mxu1 %v193_v4  ;;  %v82_v8 = vld [vmem:[#allocation2 + $0x8] sm:$0xff]  ;;  %v190_v9 = vld [vmem:[#allocation6 + $0x60] sm:$0xff]  ;;  %v188_v11 = vld [vmem:[#allocation6 + $0x50] sm:$0xff] }
  0x34   :  { %439 = vmatpush3.msra.mxu0 %v85_v1  ;;  %448 = vmatpush3.msra.mxu1 %v193_v4  ;;  %v189_v10 = vld [vmem:[#allocation6 + $0x58] sm:$0xff]  ;;  %v187_v12 = vld [vmem:[#allocation6 + $0x48] sm:$0xff]  ;;  %v186_v13 = vld [vmem:[#allocation6 + $0x40] sm:$0xff] }
  0x35   :  { %440 = vmatprep.subr.mxu0 %v84_v3  ;;  %449 = vmatprep.subr.mxu1 %v192_v5  ;;  %v185_v14 = vld [vmem:[#allocation6 + $0x38] sm:$0xff]  ;;  %v184_v15 = vld [vmem:[#allocation6 + $0x30] sm:$0xff]  ;;  %v183_v16 = vld [vmem:[#allocation6 + $0x28] sm:$0xff] }
  0x36   :  { %441 = vmatpush3.msra.mxu0 %v84_v3  ;;  %450 = vmatpush3.msra.mxu1 %v192_v5  ;;  %v182_v17 = vld [vmem:[#allocation6 + $0x20] sm:$0xff]  ;;  %v181_v18 = vld [vmem:[#allocation6 + $0x18] sm:$0xff]  ;;  %v180_v19 = vld [vmem:[#allocation6 + $0x10] sm:$0xff] }
  0x37   :  { %442 = vmatprep.subr.mxu0 %v83_v6  ;;  %451 = vmatprep.subr.mxu1 %v191_v7  ;;  %v179_v20 = vld [vmem:[#allocation6 + $0x8] sm:$0xff]  ;;  %v178_v21 = vld [vmem:[#allocation6] sm:$0xff]  ;;  %v293_v22 = vld [vmem:[#allocation7 + $0x78] sm:$0xff] }
  0x38   :  { %443 = vmatpush3.msra.mxu0 %v83_v6  ;;  %452 = vmatpush3.msra.mxu1 %v191_v7  ;;  %v292_v23 = vld [vmem:[#allocation7 + $0x70] sm:$0xff]  ;;  %v291_v24 = vld [vmem:[#allocation7 + $0x68] sm:$0xff]  ;;  %v290_v25 = vld [vmem:[#allocation7 + $0x60] sm:$0xff] }
  0x39   :  { %445 = vmatmul.mubr.msk.f32.vlgmr.msra.gmra.mxu0 %vm94_vm0, %v82_v8  ;;  %453 = vmatprep.subr.mxu1 %v190_v9  ;;  %v289_v26 = vld [vmem:[#allocation7 + $0x58] sm:$0xff]  ;;  %v288_v27 = vld [vmem:[#allocation7 + $0x50] sm:$0xff]  ;;  %v287_v28 = vld [vmem:[#allocation7 + $0x48] sm:$0xff] }
  0x3a   :  { %454 = vmatpush3.msra.mxu1 %v190_v9  ;;  %482 = vmatprep.subr.mxu0 %v293_v22  ;;  %v286_v29 = vld [vmem:[#allocation7 + $0x40] sm:$0xff]  ;;  %v285_v30 = vld [vmem:[#allocation7 + $0x38] sm:$0xff]  ;;  %v284_v31 = vld [vmem:[#allocation7 + $0x30] sm:$0xff] }
  0x3b   :  { %455 = vmatprep.subr.mxu1 %v189_v10  ;;  %483 = vmatpush3.msra.mxu0 %v293_v22  ;;  %v283_v32 = vld [vmem:[#allocation7 + $0x28] sm:$0xff]  ;;  %v282_v33 = vld [vmem:[#allocation7 + $0x20] sm:$0xff]  ;;  %v389_v34 = vld [vmem:[%s702_s2] ss:$0 sm:$0xff] }
  0x3c   :  { %456 = vmatpush3.msra.mxu1 %v189_v10  ;;  %484 = vmatprep.subr.mxu0 %v292_v23  ;;  %v281_v41 = vld [vmem:[#allocation7 + $0x18] sm:$0xff]  ;;  %v280_v42 = vld [vmem:[#allocation7 + $0x10] sm:$0xff]  ;;  %v279_v43 = vld [vmem:[#allocation7 + $0x8] sm:$0xff] }
  0x3d   :  { %457 = vmatprep.subr.mxu1 %v188_v11  ;;  %485 = vmatpush3.msra.mxu0 %v292_v23  ;;  %v278_v44 = vld [vmem:[#allocation7] sm:$0xff]  ;;  %v392_v45 = vld [vmem:[%s704_s4] ss:$0 sm:$0xff] }
  0x3e   :  { %458 = vmatpush3.msra.mxu1 %v188_v11  ;;  %486 = vmatprep.subr.mxu0 %v291_v24  ;;  %v393_v52 = vld [vmem:[%s706_s6] ss:$0 sm:$0xff] }
  0x3f   :  { %459 = vmatprep.subr.mxu1 %v187_v12  ;;  %487 = vmatpush3.msra.mxu0 %v291_v24 }
  0x40   :  { %460 = vmatpush3.msra.mxu1 %v187_v12  ;;  %488 = vmatprep.subr.mxu0 %v290_v25 }
  0x41   :  { %461 = vmatprep.subr.mxu1 %v186_v13  ;;  %489 = vmatpush3.msra.mxu0 %v290_v25 }
  0x42   :  { %462 = vmatpush3.msra.mxu1 %v186_v13  ;;  %490 = vmatprep.subr.mxu0 %v289_v26 }
  0x43   :  { %463 = vmatprep.subr.mxu1 %v185_v14  ;;  %491 = vmatpush3.msra.mxu0 %v289_v26 }
  0x44   :  { %464 = vmatpush3.msra.mxu1 %v185_v14  ;;  %492 = vmatprep.subr.mxu0 %v288_v27 }
  0x45   :  { %465 = vmatprep.subr.mxu1 %v184_v15  ;;  %493 = vmatpush3.msra.mxu0 %v288_v27 }
  0x46   :  { %466 = vmatpush3.msra.mxu1 %v184_v15  ;;  %494 = vmatprep.subr.mxu0 %v287_v28 }
  0x47   :  { %467 = vmatprep.subr.mxu1 %v183_v16  ;;  %495 = vmatpush3.msra.mxu0 %v287_v28 }
  0x48   :  { %468 = vmatpush3.msra.mxu1 %v183_v16  ;;  %496 = vmatprep.subr.mxu0 %v286_v29 }
  0x49   :  { %469 = vmatprep.subr.mxu1 %v182_v17  ;;  %497 = vmatpush3.msra.mxu0 %v286_v29 }
  0x4a   :  { %470 = vmatpush3.msra.mxu1 %v182_v17  ;;  %498 = vmatprep.subr.mxu0 %v285_v30 }
  0x4b   :  { %471 = vmatprep.subr.mxu1 %v181_v18  ;;  %499 = vmatpush3.msra.mxu0 %v285_v30 }
  0x4c   :  { %472 = vmatpush3.msra.mxu1 %v181_v18  ;;  %500 = vmatprep.subr.mxu0 %v284_v31 }
  0x4d   :  { %473 = vmatprep.subr.mxu1 %v180_v19  ;;  %501 = vmatpush3.msra.mxu0 %v284_v31 }
  0x4e   :  { %474 = vmatpush3.msra.mxu1 %v180_v19  ;;  %502 = vmatprep.subr.mxu0 %v283_v32 }
  0x4f   :  { %475 = vmatprep.subr.mxu1 %v179_v20  ;;  %503 = vmatpush3.msra.mxu0 %v283_v32 }
  0x50   :  { %476 = vmatpush3.msra.mxu1 %v179_v20  ;;  %504 = vmatprep.subr.mxu0 %v282_v33 }
  0x51   :  { %477 = vmatprep.subr.mxu1 %v178_v21  ;;  %505 = vmatpush3.msra.mxu0 %v282_v33 }
  0x52   :  { %478 = vmatpush3.msra.mxu1 %v178_v21  ;;  %506 = vmatprep.subr.mxu0 %v281_v41 }
  0x53   :  { %507 = vmatpush3.msra.mxu0 %v281_v41 }
  0x54   :  { %508 = vmatprep.subr.mxu0 %v280_v42 }
  0x55   :  { %509 = vmatpush3.msra.mxu0 %v280_v42 }
  0x56   :  { %510 = vmatprep.subr.mxu0 %v279_v43 }
  0x57   :  { %511 = vmatpush3.msra.mxu0 %v279_v43 }
  0x58   :  { %512 = vmatprep.subr.mxu0 %v278_v44 }
  0x59   :  { %513 = vmatpush3.msra.mxu0 %v278_v44 }
  0xf9   :  { %v446_v35 = vpop.f32.mrf.mxu0 }
  0xfa   :  { %v173_v36 = vadd.f32 %v446_v35, %v389_v34 }
  0xfb   :  { %v167_v37 = vpop.f32.mrf.mxu0 }
  0xfc   :  { %v168_v38 = vadd.f32 %v389_v34, %v167_v37  ;;  %v177_v40 = vmax.f32 %v173_v36, 0.0 }
  0xfe   :  { %v176_v39 = vmax.f32 %v168_v38, 0.0 }
 0x100   :  { %479 = vmatprep.mubr.f32.mxu1 %v176_v39 }
 0x101   :  { %480 = vmatmul.mubr.f32.vlgmr.msra.gmra.mxu1 %v177_v40 }
 0x1c1   :  { %v481_v46 = vpop.f32.mrf.mxu1 }
 0x1c2   :  { %v273_v47 = vadd.f32 %v481_v46, %v392_v45 }
 0x1c3   :  { %v267_v48 = vpop.f32.mrf.mxu1 }
 0x1c4   :  { %v268_v49 = vadd.f32 %v392_v45, %v267_v48  ;;  %v277_v51 = vmax.f32 %v273_v47, 0.0 }
 0x1c6   :  { %v276_v50 = vmax.f32 %v268_v49, 0.0 }
 0x1c8   :  { %514 = vmatprep.mubr.f32.mxu0 %v276_v50 }
 0x1c9   :  { %515 = vmatmul.mubr.f32.vlgmr.msra.gmra.mxu0 %v277_v51 }
 0x289   :  { %v516_v53 = vpop.f32.mrf.mxu0 }
 0x28a   :  { %v373_v54 = vadd.f32 %v516_v53, %v393_v52 }
 0x28b   :  { %v367_v55 = vpop.f32.mrf.mxu0 }
 0x28c   :  { %523 = vtanh.f32 %v373_v54  ;;  %v368_v56 = vadd.f32 %v393_v52, %v367_v55 }
 0x28e   :  { %525 = vtanh.f32 %v368_v56 }
 0x299   :  { %v524_v57 = vpop.eup %523 }
 0x29a   :  { %v379_v58 = vmul.f32 2.0, %v524_v57 }
 0x29b   :  { %v526_v59 = vpop.eup %525 }
 0x29c   :  { %381 = vst [vmem:[%s707_s7 + $0x8] sm:$0xff] %v379_v58  ;;  %v378_v60 = vmul.f32 2.0, %v526_v59 }
 0x29e   :  { %380 = vst [vmem:[%s707_s7] sm:$0xff] %v378_v60 }
 0x29f   :  { %386 = vsyncpa [#allocation3], 1 }
 0x2a0   :  { %387 = vsyncpa [#allocation5], 1 }
 0x2a1   :  { %388 = vsyncpa [#allocation8], 1 }

</bundles_post_ra>
